<compile_context>
chip_gen: v7x
topology: tpu7x:2x2x1
jax: 0.10.0
libtpu: 0.0.40
codegen_flags: <defaults>
</compile_context>

<pallas_src>
import jax
import jax.numpy as jnp
from jax.experimental import pallas as pl
from jax.experimental.pallas import tpu as pltpu


def _linear_cat_kernel(x_ref, wt_ref, b_ref, o_ref):
    # x_ref : (2, 4) f32  -- input batch
    # wt_ref: (4, 2) f32  -- W^T (transpose done in the wrapper jit)
    # b_ref : (1, 2) f32  -- bias
    # o_ref : (6, 2) f32  -- [y; y; y]
    x = x_ref[...]            # (2, 4)
    wt = wt_ref[...]          # (4, 2)
    b = b_ref[...]            # (1, 2)

    # y = x @ W^T + b, K=4 unrolled as VPU broadcast-FMAs (no MXU).
    p0 = x[:, 0:1] * wt[0:1, :]
    p1 = x[:, 1:2] * wt[1:2, :]
    p2 = x[:, 2:3] * wt[2:3, :]
    p3 = x[:, 3:4] * wt[3:4, :]
    # Reassociated to expose 2-wide ILP across the 4 VALU slots.
    y = (b + p0 + p1) + (p2 + p3)          # (2, 2)

    # cat((y, y), dim=0) followed by the (interpreted) cat with the view of y
    # is simply [y; y; y] -> (6, 2): three direct sub-slice stores, no
    # in-kernel concatenate.
    o_ref[0:2, :] = y
    o_ref[2:4, :] = y
    o_ref[4:6, :] = y


@jax.jit
def model_forward(x, weight, bias):
    # Feed operands directly; no slab packing, no extra HBM round trip.
    x32 = x.astype(jnp.float32)                       # (2, 4)
    wt = weight.astype(jnp.float32).T                 # (4, 2)
    b = bias.astype(jnp.float32).reshape(1, 2)        # (1, 2)

    out = pl.pallas_call(
        _linear_cat_kernel,
        out_shape=jax.ShapeDtypeStruct((6, 2), jnp.float32),
        in_specs=[
            pl.BlockSpec(memory_space=pltpu.MemorySpace.VMEM),
            pl.BlockSpec(memory_space=pltpu.MemorySpace.VMEM),
            pl.BlockSpec(memory_space=pltpu.MemorySpace.VMEM),
        ],
        out_specs=pl.BlockSpec(memory_space=pltpu.MemorySpace.VMEM),
        cost_estimate=pl.CostEstimate(
            flops=40,                     # 16 MACs + bias adds
            transcendentals=0,
            bytes_accessed=(2 * 4 + 4 * 2 + 2 + 6 * 2) * 4,
        ),
    )(x32, wt, b)
    # Free metadata reshape to the (1, 4, 2) ++ (1, 2, 2) interpretation.
    return out.reshape(1, 6, 2)


if __name__ == "__main__":
    key = jax.random.PRNGKey(0)
    kx, kw, kb = jax.random.split(key, 3)

    # Deterministic inputs / parameters (shapes from the module's __init__).
    x = jax.random.normal(kx, (2, 4), dtype=jnp.float32)
    weight = jax.random.normal(kw, (2, 4), dtype=jnp.float32) * 0.5  # Linear(4, 2).weight
    bias = jax.random.normal(kb, (2,), dtype=jnp.float32) * 0.1      # Linear(4, 2).bias

    result = model_forward(x, weight, bias)
    jax.block_until_ready(result)

    # Cross-check against a pure-JAX reference of the same interpretation.
    y_ref = x @ weight.T + bias
    ref = jnp.concatenate([y_ref, y_ref, y_ref], axis=0).reshape(1, 6, 2)
    assert result.shape == (1, 6, 2)
    assert jnp.allclose(result, ref, atol=1e-5), "mismatch vs reference"

    print("KERNEL_OK")
</pallas_src>

<mosaic_0001>
module attributes {stable_mosaic.version = 11 : i64} {
  func.func @_linear_cat_kernel(%arg0: memref<2x4xf32, #tpu.memory_space<vmem>>, %arg1: memref<4x2xf32, #tpu.memory_space<vmem>>, %arg2: memref<1x2xf32, #tpu.memory_space<vmem>>, %arg3: memref<6x2xf32, #tpu.memory_space<vmem>>) attributes {dimension_semantics = [], scalar_prefetch = 0 : i64, scratch_operands = 0 : i64, tpu.core_type = #tpu.core_type<tc>} {
    %c0 = arith.constant 0 : index
    %c0_0 = arith.constant 0 : index
    %0 = vector.load %arg0[%c0, %c0_0] : memref<2x4xf32, #tpu.memory_space<vmem>>, vector<2x4xf32>
    %c0_1 = arith.constant 0 : index
    %c0_2 = arith.constant 0 : index
    %1 = vector.load %arg1[%c0_1, %c0_2] : memref<4x2xf32, #tpu.memory_space<vmem>>, vector<4x2xf32>
    %c0_3 = arith.constant 0 : index
    %c0_4 = arith.constant 0 : index
    %2 = vector.load %arg2[%c0_3, %c0_4] : memref<1x2xf32, #tpu.memory_space<vmem>>, vector<1x2xf32>
    %3 = vector.extract_strided_slice %0 {offsets = [0, 0], sizes = [2, 1], strides = [1, 1]} : vector<2x4xf32> to vector<2x1xf32>
    %4 = vector.extract_strided_slice %1 {offsets = [0, 0], sizes = [1, 2], strides = [1, 1]} : vector<4x2xf32> to vector<1x2xf32>
    %5 = vector.broadcast %3 : vector<2x1xf32> to vector<2x2xf32>
    %6 = vector.broadcast %4 : vector<1x2xf32> to vector<2x2xf32>
    %7 = arith.mulf %5, %6 : vector<2x2xf32>
    %8 = vector.extract_strided_slice %0 {offsets = [0, 1], sizes = [2, 1], strides = [1, 1]} : vector<2x4xf32> to vector<2x1xf32>
    %9 = vector.extract_strided_slice %1 {offsets = [1, 0], sizes = [1, 2], strides = [1, 1]} : vector<4x2xf32> to vector<1x2xf32>
    %10 = vector.broadcast %8 : vector<2x1xf32> to vector<2x2xf32>
    %11 = vector.broadcast %9 : vector<1x2xf32> to vector<2x2xf32>
    %12 = arith.mulf %10, %11 : vector<2x2xf32>
    %13 = vector.extract_strided_slice %0 {offsets = [0, 2], sizes = [2, 1], strides = [1, 1]} : vector<2x4xf32> to vector<2x1xf32>
    %14 = vector.extract_strided_slice %1 {offsets = [2, 0], sizes = [1, 2], strides = [1, 1]} : vector<4x2xf32> to vector<1x2xf32>
    %15 = vector.broadcast %13 : vector<2x1xf32> to vector<2x2xf32>
    %16 = vector.broadcast %14 : vector<1x2xf32> to vector<2x2xf32>
    %17 = arith.mulf %15, %16 : vector<2x2xf32>
    %18 = vector.extract_strided_slice %0 {offsets = [0, 3], sizes = [2, 1], strides = [1, 1]} : vector<2x4xf32> to vector<2x1xf32>
    %19 = vector.extract_strided_slice %1 {offsets = [3, 0], sizes = [1, 2], strides = [1, 1]} : vector<4x2xf32> to vector<1x2xf32>
    %20 = vector.broadcast %18 : vector<2x1xf32> to vector<2x2xf32>
    %21 = vector.broadcast %19 : vector<1x2xf32> to vector<2x2xf32>
    %22 = arith.mulf %20, %21 : vector<2x2xf32>
    %23 = vector.broadcast %2 : vector<1x2xf32> to vector<2x2xf32>
    %24 = arith.addf %23, %7 : vector<2x2xf32>
    %25 = arith.addf %24, %12 : vector<2x2xf32>
    %26 = arith.addf %17, %22 : vector<2x2xf32>
    %27 = arith.addf %25, %26 : vector<2x2xf32>
    %c0_5 = arith.constant 0 : index
    %c0_6 = arith.constant 0 : index
    %28 = vector.load %arg3[%c0_5, %c0_6] : memref<6x2xf32, #tpu.memory_space<vmem>>, vector<2x2xf32>
    tpu.vector_store %arg3[%c0_5, %c0_6], %27 {strides = array<i32>} : memref<6x2xf32, #tpu.memory_space<vmem>>, vector<2x2xf32>,
    %c2 = arith.constant 2 : index
    %c0_7 = arith.constant 0 : index
    %29 = vector.load %arg3[%c2, %c0_7] : memref<6x2xf32, #tpu.memory_space<vmem>>, vector<2x2xf32>
    tpu.vector_store %arg3[%c2, %c0_7], %27 {strides = array<i32>} : memref<6x2xf32, #tpu.memory_space<vmem>>, vector<2x2xf32>,
    %c4 = arith.constant 4 : index
    %c0_8 = arith.constant 0 : index
    %30 = vector.load %arg3[%c4, %c0_8] : memref<6x2xf32, #tpu.memory_space<vmem>>, vector<2x2xf32>
    tpu.vector_store %arg3[%c4, %c0_8], %27 {strides = array<i32>} : memref<6x2xf32, #tpu.memory_space<vmem>>, vector<2x2xf32>,
    return
  }
}

</mosaic_0001>

<bundles_post_ra>
// kernel: model_forward.1
= control target key start
LH: loop header
LB: loop body
LE: loop exit
PB: predicated region body
PF: predicated region fallthrough
CT: control target
= control target key end

     0   :  { %v82_v0 = vmov 2   ;;  %v83_v1 = vmov 0   ;;  %v84_v3 = vmov 3   ;;  %v85_v4 = vmov 1   ;;  %s124_s0 = inlined_call_operand.vmem [shape: f32[2,4], index: 0, kind: input, shape index: {}]   ;;  %s125_s1 = inlined_call_operand.vmem [shape: f32[4,2], index: 1, kind: input, shape index: {}]   ;;  %s126_s2 = inlined_call_operand.vmem [shape: f32[1,2], index: 2, kind: input, shape index: {}]   ;;  %s127_s3 = inlined_call_operand.vmem [shape: f32[6,2], index: 3, kind: output, shape index: {}]  }
   0x1   :  { %79 = vset.pattern.permute.xlu1 %v82_v0  ;;  %77 = vset.pattern.permute.xlu0 %v83_v1  ;;  %v14_v2 = vld [vmem:[%s124_s0] sm:$0x3]  ;;  %v22_v5 = vlaneseq  ;;  %vm64_vm0 = vcmask 9216  }
   0x2   :  { %37 = vperm.xlu1 %79, %v14_v2   ;;  %19 = vperm.xlu0 %77, %v14_v2   ;;  %v15_v8 = vld [vmem:[%s125_s1] sm:$0xf] }
   0x3   :  { %v23_v6 = vshrl.u32 %v22_v5, 7  ;;  %v72_v19 = vld [vmem:[%s126_s2] ss:$0 sm:$0xff] }
   0x5   :  { %v24_v7 = vsub.s32 0, %v23_v6  ;;  %v42_v9 = vsub.s32 2, %v23_v6  ;;  %v51_v11 = vsub.s32 3, %v23_v6  ;;  %v33_v12 = vsub.s32 1, %v23_v6 }
   0x6   :  { %80 = vset.pattern.permute.xlu1 %v84_v3  ;;  %78 = vset.pattern.permute.xlu0 %v85_v4 }
   0x7   :  { %46 = vperm.xlu1 %80, %v14_v2   ;;  %28 = vperm.xlu0 %78, %v14_v2   ;;  %v25_v10 = vrot.slane %v15_v8, %v24_v7  ;;  %v43_v15 = vrot.slane %v15_v8, %v42_v9  ;;  %v52_v17 = vrot.slane %v15_v8, %v51_v11 }
   0x8   :  { %v34_v18 = vrot.slane %v15_v8, %v33_v12 }
   0xb   :  { %81 = vset.pattern.permute.xlu0 %v84_v3 }
  0x81   :  { %v38_v13 = vpop.permute.xlu1 %37  ;;  %v20_v14 = vpop.permute.xlu0 %19 }
  0x82   :  { %v26_v16 = vmul.f32 %v25_v10, %v20_v14  ;;  %v44_v22 = vmul.f32 %v43_v15, %v38_v13 }
  0x84   :  { %v60_v23 = vadd.f32 %v72_v19, %v26_v16 }
  0x86   :  { %v47_v20 = vpop.permute.xlu1 %46  ;;  %v29_v21 = vpop.permute.xlu0 %28 }
  0x87   :  { %v53_v24 = vmul.f32 %v52_v17, %v47_v20  ;;  %v35_v25 = vmul.f32 %v34_v18, %v29_v21 }
  0x89   :  { %v62_v26 = vadd.f32 %v53_v24, %v44_v22  ;;  %v61_v27 = vadd.f32 %v60_v23, %v35_v25 }
  0x8b   :  { %v63_v28 = vadd.f32 %v62_v26, %v61_v27 }
  0x8d   :  { %65 = vst.msk [vmem:[%s127_s3] sm:$0x3] %vm64_vm0, %v63_v28  ;;  %66 = vst.msk [vmem:[%s127_s3 + $0x2] sm:$0x3] %vm64_vm0, %v63_v28 }
  0x8e   :  { %67 = vst.msk [vmem:[%s127_s3 + $0x4] sm:$0x3] %vm64_vm0, %v63_v28 }

</bundles_post_ra>
